<compile_context>
chip_gen: v7x
topology: tpu7x:2x2x1
jax: 0.10.0
libtpu: 0.0.40
codegen_flags: <defaults>
</compile_context>

<pallas_src>
import functools

import jax
import jax.numpy as jnp
from jax.experimental import pallas as pl
from jax.experimental.pallas import tpu as pltpu

BN_EPS = 1e-5
LANE = 128


def _actor_kernel(x_ref, w1_ref, vec_ref, w2_ref, w3_ref, o_ref, *, f1, f2, n_out):
    # ---- fc1 (bias omitted: exactly cancelled by training-mode BN) ----
    x = x_ref[...].astype(w1_ref.dtype)                      # f32 -> bf16 pack in-kernel
    h1 = jnp.dot(x, w1_ref[...],
                 preferred_element_type=jnp.float32)         # [B, f1] f32

    # ---- BatchNorm1d (training-mode batch stats), affine folded into scale ----
    mean = jnp.mean(h1, axis=0, keepdims=True)               # [1, f1]
    d = h1 - mean
    var = jnp.mean(d * d, axis=0, keepdims=True)             # biased variance
    gamma = vec_ref[0:1, :f1]
    beta = vec_ref[1:2, :f1]
    scale = gamma * jax.lax.rsqrt(var + BN_EPS)               # EUP rsqrt
    h1r = jnp.maximum(d * scale + beta, 0.0)                  # [B, f1]

    # ---- fc2 + ReLU (bf16 into MXU, f32 accumulate) ----
    b2 = vec_ref[2:3, :f2]
    h2 = jnp.dot(h1r.astype(w2_ref.dtype), w2_ref[...],
                 preferred_element_type=jnp.float32) + b2
    h2r = jnp.maximum(h2, 0.0)

    # ---- fc3 + tanh (output padded to 128 lanes -> unmasked stores) ----
    b3 = vec_ref[3:4, :n_out]
    h3 = jnp.dot(h2r.astype(w3_ref.dtype), w3_ref[...],
                 preferred_element_type=jnp.float32) + b3
    o_ref[...] = jnp.tanh(h3)


def prepare_params(params, *, compute_dtype=jnp.bfloat16):
    """One-time (out of hot path) cast/pad/pack of the Actor parameters.

    Returns a dict of device arrays plus static sizes, ready for actor_forward.
    """
    f1 = int(params["w1"].shape[1])
    f2 = int(params["w2"].shape[1])
    action_size = int(params["w3"].shape[1])
    n_pad = -action_size % LANE
    n_out = action_size + n_pad
    width = max(f1, f2, n_out)
    width = -(-width // LANE) * LANE                          # round up to lane multiple

    def row(v, n):
        v = jnp.asarray(v, jnp.float32).reshape(1, -1)
        return jnp.pad(v, ((0, 0), (0, width - n)))

    b3_padded = jnp.pad(jnp.asarray(params["b3"], jnp.float32).reshape(1, -1),
                        ((0, 0), (0, n_pad)))
    vec = jnp.concatenate(
        [row(params["gamma"], f1),
         row(params["beta"], f1),
         row(params["b2"], f2),
         row(b3_padded, n_out)],
        axis=0)                                               # [4, width] f32 slab

    return {
        # fc1 bias intentionally dropped: cancelled by training-mode BN.
        "w1": params["w1"].astype(compute_dtype),             # [S,  f1]
        "w2": params["w2"].astype(compute_dtype),             # [f1, f2]
        "w3": jnp.pad(params["w3"],
                      ((0, 0), (0, n_pad))).astype(compute_dtype),  # [f2, n_out]
        "vec": vec,
        "f1": f1,
        "f2": f2,
        "n_out": n_out,
        "action_size": action_size,
    }


def actor_forward(state, prepared, *, slice_output=True):
    """state: [B, state_size] f32.  prepared: dict from prepare_params.

    Returns [B, action_size] f32 (or the padded [B, n_out] block if
    slice_output=False and the consumer tolerates zero-padded extra columns).
    """
    B, S = state.shape
    f1, f2, n_out = prepared["f1"], prepared["f2"], prepared["n_out"]

    args = (state, prepared["w1"], prepared["vec"], prepared["w2"], prepared["w3"])

    vmem = pl.BlockSpec(memory_space=pltpu.MemorySpace.VMEM)
    flops = 2 * B * (S * f1 + f1 * f2 + f2 * n_out)
    bytes_accessed = (sum(int(a.size) * a.dtype.itemsize for a in args)
                      + B * n_out * 4)
    cost = pl.CostEstimate(flops=flops,
                           transcendentals=B * n_out + f1,    # tanh + rsqrt
                           bytes_accessed=bytes_accessed)

    kernel = functools.partial(_actor_kernel, f1=f1, f2=f2, n_out=n_out)
    out = pl.pallas_call(
        kernel,
        out_shape=jax.ShapeDtypeStruct((B, n_out), jnp.float32),
        in_specs=[vmem] * len(args),
        out_specs=vmem,
        cost_estimate=cost,
    )(*args)

    if slice_output:
        return out[:, :prepared["action_size"]]
    return out


def init_params(key, state_size, action_size, fc1_units=256, fc2_units=128):
    """Synthetic init mirroring the PyTorch module's scheme.

    hidden_init uses weight.size()[0] == out_features (PyTorch quirk), so
    lim = 1/sqrt(out_features) for fc1/fc2; fc3 weights uniform(-3e-3, 3e-3).
    Biases use the default Linear init uniform(-1/sqrt(in), 1/sqrt(in)).
    """
    ks = jax.random.split(key, 8)
    f32 = jnp.float32

    def u(k, shape, lim):
        return jax.random.uniform(k, shape, dtype=f32, minval=-lim, maxval=lim)

    lim1 = 1.0 / jnp.sqrt(float(fc1_units))
    lim2 = 1.0 / jnp.sqrt(float(fc2_units))
    return {
        # weights stored [in, out]
        "w1": u(ks[0], (state_size, fc1_units), lim1),
        "b1": u(ks[1], (1, fc1_units), 1.0 / jnp.sqrt(float(state_size))),
        "gamma": jnp.ones((1, fc1_units), f32),
        "beta": jnp.zeros((1, fc1_units), f32),
        "w2": u(ks[2], (fc1_units, fc2_units), lim2),
        "b2": u(ks[3], (1, fc2_units), 1.0 / jnp.sqrt(float(fc1_units))),
        "w3": u(ks[4], (fc2_units, action_size), 3e-3),
        "b3": u(ks[5], (1, action_size), 1.0 / jnp.sqrt(float(fc2_units))),
    }


def actor_ref_f32(state, p):
    """Pure-f32 JAX reference matching the PyTorch module exactly (incl. fc1 bias)."""
    h1 = state @ p["w1"] + p["b1"]
    mean = jnp.mean(h1, axis=0, keepdims=True)
    var = jnp.mean((h1 - mean) ** 2, axis=0, keepdims=True)
    h1 = (h1 - mean) / jnp.sqrt(var + BN_EPS) * p["gamma"] + p["beta"]
    h1 = jnp.maximum(h1, 0.0)
    h2 = jnp.maximum(h1 @ p["w2"] + p["b2"], 0.0)
    return jnp.tanh(h2 @ p["w3"] + p["b3"])


def actor_ref_kernel_math(state, p, compute_dtype=jnp.bfloat16):
    """JAX reference using the same bf16-in / f32-accumulate arithmetic as the kernel."""
    x = state.astype(compute_dtype)
    w1 = p["w1"].astype(compute_dtype)
    w2 = p["w2"].astype(compute_dtype)
    w3 = p["w3"].astype(compute_dtype)
    h1 = jnp.dot(x, w1, preferred_element_type=jnp.float32)
    mean = jnp.mean(h1, axis=0, keepdims=True)
    d = h1 - mean
    var = jnp.mean(d * d, axis=0, keepdims=True)
    scale = p["gamma"] * jax.lax.rsqrt(var + BN_EPS)
    h1r = jnp.maximum(d * scale + p["beta"], 0.0)
    h2 = jnp.maximum(jnp.dot(h1r.astype(compute_dtype), w2,
                             preferred_element_type=jnp.float32) + p["b2"], 0.0)
    h3 = jnp.dot(h2.astype(compute_dtype), w3,
                 preferred_element_type=jnp.float32) + p["b3"]
    return jnp.tanh(h3)


if __name__ == "__main__":
    key = jax.random.PRNGKey(0)
    k_param, k_state = jax.random.split(key)

    # batch >= 16 fills the bf16 sublane tile; small sizes per the module spec.
    batch, state_size, action_size = 16, 32, 4
    params = init_params(k_param, state_size, action_size)
    prepared = prepare_params(params)          # one-time cast/pad/pack (not per call)
    state = jax.random.normal(k_state, (batch, state_size), dtype=jnp.float32)

    out = actor_forward(state, prepared)
    out = jax.block_until_ready(out)
    assert out.shape == (batch, action_size)

    # Tight check against a reference doing the identical (bf16/f32) arithmetic.
    ref_same = actor_ref_kernel_math(state, params)
    assert jnp.allclose(out, ref_same, atol=1e-4, rtol=1e-4), \
        "mismatch vs bf16-matched reference"

    # Looser check against the full-precision PyTorch-equivalent math
    # (difference is only the bf16 MXU-input precision tradeoff).
    ref_f32 = actor_ref_f32(state, params)
    assert jnp.allclose(out, ref_f32, atol=3e-2, rtol=3e-2), \
        "mismatch vs f32 reference"

    # Padded (un-sliced) output path: extra columns are exactly tanh(0) = 0.
    out_padded = jax.block_until_ready(actor_forward(state, prepared, slice_output=False))
    assert out_padded.shape == (batch, prepared["n_out"])
    assert jnp.all(out_padded[:, action_size:] == 0.0)

    print("KERNEL_OK")
</pallas_src>

<mosaic_0001>
module attributes {stable_mosaic.version = 11 : i64} {
  func.func @_actor_kernel(%arg0: memref<16x32xf32, #tpu.memory_space<vmem>>, %arg1: memref<32x256xbf16, #tpu.memory_space<vmem>>, %arg2: memref<4x256xf32, #tpu.memory_space<vmem>>, %arg3: memref<256x128xbf16, #tpu.memory_space<vmem>>, %arg4: memref<128x128xbf16, #tpu.memory_space<vmem>>, %arg5: memref<16x128xf32, #tpu.memory_space<vmem>>) attributes {dimension_semantics = [], scalar_prefetch = 0 : i64, scratch_operands = 0 : i64, tpu.core_type = #tpu.core_type<tc>} {
    %c0 = arith.constant 0 : index
    %c0_0 = arith.constant 0 : index
    %0 = vector.load %arg0[%c0, %c0_0] : memref<16x32xf32, #tpu.memory_space<vmem>>, vector<16x32xf32>
    %1 = arith.truncf %0 : vector<16x32xf32> to vector<16x32xbf16>
    %c0_1 = arith.constant 0 : index
    %c0_2 = arith.constant 0 : index
    %2 = vector.load %arg1[%c0_1, %c0_2] : memref<32x256xbf16, #tpu.memory_space<vmem>>, vector<32x256xbf16>
    %cst = arith.constant dense<0.000000e+00> : vector<16x256xf32>
    %3 = tpu.matmul %1, %2, %cst {dimension_numbers = #tpu.dot_dimension_numbers<[1], [0], [0], [1], [0, 0, 1, 1], [], []>} : vector<16x32xbf16>, vector<32x256xbf16>, vector<16x256xf32> -> vector<16x256xf32>
    %cst_3 = arith.constant dense<0.000000e+00> : vector<256xf32>
    %4 = vector.multi_reduction <add>, %3, %cst_3 [0] : vector<16x256xf32> to vector<256xf32>
    %5 = vector.shape_cast %4 : vector<256xf32> to vector<1x256xf32>
    %cst_4 = arith.constant 1.600000e+01 : f32
    %6 = vector.broadcast %cst_4 : f32 to vector<1x256xf32>
    %7 = arith.divf %5, %6 : vector<1x256xf32>
    %8 = vector.broadcast %7 : vector<1x256xf32> to vector<16x256xf32>
    %9 = arith.subf %3, %8 : vector<16x256xf32>
    %10 = arith.mulf %9, %9 : vector<16x256xf32>
    %cst_5 = arith.constant dense<0.000000e+00> : vector<256xf32>
    %11 = vector.multi_reduction <add>, %10, %cst_5 [0] : vector<16x256xf32> to vector<256xf32>
    %12 = vector.shape_cast %11 : vector<256xf32> to vector<1x256xf32>
    %cst_6 = arith.constant 1.600000e+01 : f32
    %13 = vector.broadcast %cst_6 : f32 to vector<1x256xf32>
    %14 = arith.divf %12, %13 : vector<1x256xf32>
    %c0_7 = arith.constant 0 : index
    %c0_8 = arith.constant 0 : index
    %15 = vector.load %arg2[%c0_7, %c0_8] : memref<4x256xf32, #tpu.memory_space<vmem>>, vector<1x256xf32>
    %c1 = arith.constant 1 : index
    %c0_9 = arith.constant 0 : index
    %16 = vector.load %arg2[%c1, %c0_9] : memref<4x256xf32, #tpu.memory_space<vmem>>, vector<1x256xf32>
    %cst_10 = arith.constant 9.99999974E-6 : f32
    %17 = vector.broadcast %cst_10 : f32 to vector<1x256xf32>
    %18 = arith.addf %14, %17 : vector<1x256xf32>
    %19 = math.rsqrt %18 : vector<1x256xf32>
    %20 = arith.mulf %15, %19 : vector<1x256xf32>
    %21 = vector.broadcast %20 : vector<1x256xf32> to vector<16x256xf32>
    %22 = arith.mulf %9, %21 : vector<16x256xf32>
    %23 = vector.broadcast %16 : vector<1x256xf32> to vector<16x256xf32>
    %24 = arith.addf %22, %23 : vector<16x256xf32>
    %cst_11 = arith.constant 0.000000e+00 : f32
    %25 = vector.broadcast %cst_11 : f32 to vector<16x256xf32>
    %26 = arith.maximumf %24, %25 : vector<16x256xf32>
    %c2 = arith.constant 2 : index
    %c0_12 = arith.constant 0 : index
    %27 = vector.load %arg2[%c2, %c0_12] : memref<4x256xf32, #tpu.memory_space<vmem>>, vector<1x128xf32>
    %28 = arith.truncf %26 : vector<16x256xf32> to vector<16x256xbf16>
    %c0_13 = arith.constant 0 : index
    %c0_14 = arith.constant 0 : index
    %29 = vector.load %arg3[%c0_13, %c0_14] : memref<256x128xbf16, #tpu.memory_space<vmem>>, vector<256x128xbf16>
    %cst_15 = arith.constant dense<0.000000e+00> : vector<16x128xf32>
    %30 = tpu.matmul %28, %29, %cst_15 {dimension_numbers = #tpu.dot_dimension_numbers<[1], [0], [0], [1], [0, 0, 1, 1], [], []>} : vector<16x256xbf16>, vector<256x128xbf16>, vector<16x128xf32> -> vector<16x128xf32>
    %31 = vector.broadcast %27 : vector<1x128xf32> to vector<16x128xf32>
    %32 = arith.addf %30, %31 : vector<16x128xf32>
    %cst_16 = arith.constant 0.000000e+00 : f32
    %33 = vector.broadcast %cst_16 : f32 to vector<16x128xf32>
    %34 = arith.maximumf %32, %33 : vector<16x128xf32>
    %c3 = arith.constant 3 : index
    %c0_17 = arith.constant 0 : index
    %35 = vector.load %arg2[%c3, %c0_17] : memref<4x256xf32, #tpu.memory_space<vmem>>, vector<1x128xf32>
    %36 = arith.truncf %34 : vector<16x128xf32> to vector<16x128xbf16>
    %c0_18 = arith.constant 0 : index
    %c0_19 = arith.constant 0 : index
    %37 = vector.load %arg4[%c0_18, %c0_19] : memref<128x128xbf16, #tpu.memory_space<vmem>>, vector<128x128xbf16>
    %cst_20 = arith.constant dense<0.000000e+00> : vector<16x128xf32>
    %38 = tpu.matmul %36, %37, %cst_20 {dimension_numbers = #tpu.dot_dimension_numbers<[1], [0], [0], [1], [0, 0, 1, 1], [], []>} : vector<16x128xbf16>, vector<128x128xbf16>, vector<16x128xf32> -> vector<16x128xf32>
    %39 = vector.broadcast %35 : vector<1x128xf32> to vector<16x128xf32>
    %40 = arith.addf %38, %39 : vector<16x128xf32>
    %41 = math.tanh %40 : vector<16x128xf32>
    %c0_21 = arith.constant 0 : index
    %c0_22 = arith.constant 0 : index
    %42 = vector.load %arg5[%c0_21, %c0_22] : memref<16x128xf32, #tpu.memory_space<vmem>>, vector<16x128xf32>
    tpu.vector_store %arg5[%c0_21, %c0_22], %41 {strides = array<i32>} : memref<16x128xf32, #tpu.memory_space<vmem>>, vector<16x128xf32>,
    return
  }
}

</mosaic_0001>

<bundles_post_ra>
// kernel: tpu_custom_call.1
= control target key start
LH: loop header
LB: loop body
LE: loop exit
PB: predicated region body
PF: predicated region fallthrough
CT: control target
= control target key end

     0   :  { %10 = vsyncpa [#allocation3], 0  ;;  %s996_s0 = inlined_call_operand.hbm [shape: f32[16,32], index: 0, kind: input, shape index: {}]   ;;  %s997_s1 = inlined_call_operand.hbm [shape: bf16[32,256], index: 1, kind: input, shape index: {}]   ;;  %s998_s2 = inlined_call_operand.hbm [shape: f32[4,256], index: 2, kind: input, shape index: {}]   ;;  %s999_s3 = inlined_call_operand.hbm [shape: bf16[256,128], index: 3, kind: input, shape index: {}]   ;;  %s1000_s4 = inlined_call_operand.hbm [shape: bf16[128,128], index: 4, kind: input, shape index: {}]   ;;  %s1001_s5 = inlined_call_operand.hbm [shape: f32[16,128], index: 5, kind: output, shape index: {}]  }
   0x1   :  { %11 = vsyncpa [#allocation6], 0 }
   0x2   :  { %12 = vsyncpa [#allocation9], 0 }
   0x3   :  { %13 = vsyncpa [#allocation4], 0  ;;  %s849_s18 = smov [#allocation5]   ;;  %s850_s20 = smov [#allocation8]  }
   0x4   :  { %s31_s19 = sshll.u32 %s849_s18, 4  ;;  %s53_s21 = sshll.u32 %s850_s20, 4  ;;  %s32_s19 = int_to_ptr.vmem [resolvable:$true] %s31_s19  ;;  %s893_s21 = int_to_ptr.vmem [resolvable:$true] %s53_s21 }
   0x5   :  { %s709_s24 = scalar_lea.hbm %s997_s1, 512 }
   0x6   :  { %p710_p0 = scmp.ne.s32.totalorder %s997_s1, %s709_s24  ;;  %p713_p1 = scmp.lt.u32.totalorder %s709_s24, %s997_s1 }
   0x8   :  { %p715_p2 = pnand %p713_p1, %p710_p0 }
   0xa   :  { %718 = shalt.err (!%p715_p2)
}
   0xb   :  { %s719_s29 = scalar_lea.vmem %s32_s19, 512  ;;  %p724_p4 = scmp.lt.s32.totalorder %s32_s19, %s32_s19 }
   0xc   :  { %p720_p3 = scmp.ne.s32.totalorder %s32_s19, %s719_s29  ;;  %p725_p5 = scmp.lt.s32.totalorder %s719_s29, %s719_s29 }
   0xe   :  { %p726_p6 = por %p725_p5, %p724_p4 }
  0x10   :  { %p727_p7 = pnand %p726_p6, %p720_p3 }
  0x12   :  { %730 = shalt.err (!%p727_p7)
}
  0x13   :  { %s851_s30 = smov 128   ;;  %s852_s6 = smov 8  }
  0x14   :  { %37 = dma.hbm_to_vmem [thread:$0]  %s997_s1, 512, %s32_s19, [#allocation6], %s851_s30, %s851_s30, %s852_s6  }
  0x15   :  { %s731_s11 = scalar_lea.hbm %s999_s3, 2048 }
  0x16   :  { %p732_p8 = scmp.ne.s32.totalorder %s999_s3, %s731_s11  ;;  %p735_p9 = scmp.lt.u32.totalorder %s731_s11, %s999_s3 }
  0x18   :  { %p737_p10 = pnand %p735_p9, %p732_p8 }
  0x1a   :  { %740 = shalt.err (!%p737_p10)
}
  0x1b   :  { %s741_s16 = scalar_lea.vmem %s893_s21, 2048  ;;  %p746_p12 = scmp.lt.s32.totalorder %s893_s21, %s893_s21 }
  0x1c   :  { %p742_p11 = scmp.ne.s32.totalorder %s893_s21, %s741_s16  ;;  %p747_p13 = scmp.lt.s32.totalorder %s741_s16, %s741_s16 }
  0x1e   :  { %p748_p0 = por %p747_p13, %p746_p12 }
  0x20   :  { %p749_p1 = pnand %p748_p0, %p742_p11 }
  0x22   :  { %752 = shalt.err (!%p749_p1)
}
  0x23   :  { %s853_s1 = smov 64   ;;  %s854_s17 = smov 4  }
  0x24   :  { %59 = dma.hbm_to_vmem [thread:$0]  %s999_s3, 2048, %s893_s21, [#allocation9], %s853_s1, %s853_s1, %s854_s17  }
  0x25   :  { %s855_s20 = smov [#allocation2]   ;;  %s856_s23 = smov [#allocation7]  }
  0x26   :  { %s19_s22 = sshll.u32 %s855_s20, 4  ;;  %s44_s24 = sshll.u32 %s856_s23, 4  ;;  %s20_s22 = int_to_ptr.vmem [resolvable:$true] %s19_s22  ;;  %s45_s24 = int_to_ptr.vmem [resolvable:$true] %s44_s24 }
  0x27   :  { %s753_s27 = scalar_lea.hbm %s996_s0, 256 }
  0x28   :  { %p754_p2 = scmp.ne.s32.totalorder %s996_s0, %s753_s27  ;;  %p757_p3 = scmp.lt.u32.totalorder %s753_s27, %s996_s0 }
  0x2a   :  { %p759_p4 = pnand %p757_p3, %p754_p2 }
  0x2c   :  { %762 = shalt.err (!%p759_p4)
}
  0x2d   :  { %s763_s3 = scalar_lea.vmem %s20_s22, 256  ;;  %p768_p6 = scmp.lt.s32.totalorder %s20_s22, %s20_s22 }
  0x2e   :  { %p764_p5 = scmp.ne.s32.totalorder %s20_s22, %s763_s3  ;;  %p769_p7 = scmp.lt.s32.totalorder %s763_s3, %s763_s3 }
  0x30   :  { %p770_p8 = por %p769_p7, %p768_p6 }
  0x32   :  { %p771_p9 = pnand %p770_p8, %p764_p5 }
  0x34   :  { %774 = shalt.err (!%p771_p9)
}
  0x35   :  { %25 = dma.hbm_to_vmem [thread:$0]  %s996_s0, 256, %s20_s22, [#allocation3], %s851_s30, %s851_s30, %s852_s6  }
  0x36   :  { %s775_s12 = scalar_lea.hbm %s998_s2, 128 }
  0x37   :  { %p776_p10 = scmp.ne.s32.totalorder %s998_s2, %s775_s12  ;;  %p779_p11 = scmp.lt.u32.totalorder %s775_s12, %s998_s2 }
  0x39   :  { %p781_p12 = pnand %p779_p11, %p776_p10 }
  0x3b   :  { %784 = shalt.err (!%p781_p12)
}
  0x3c   :  { %s785_s18 = scalar_lea.vmem %s45_s24, 128  ;;  %p790_p0 = scmp.lt.s32.totalorder %s45_s24, %s45_s24 }
  0x3d   :  { %p786_p13 = scmp.ne.s32.totalorder %s45_s24, %s785_s18  ;;  %p791_p1 = scmp.lt.s32.totalorder %s785_s18, %s785_s18 }
  0x3f   :  { %p792_p2 = por %p791_p1, %p790_p0 }
  0x41   :  { %p793_p3 = pnand %p792_p2, %p786_p13 }
  0x43   :  { %796 = shalt.err (!%p793_p3)
}
  0x44   :  { %47 = dma.hbm_to_vmem [thread:$0]  %s998_s2, 128, %s45_s24, [#allocation6]  }
  0x45   :  { %s857_s20 = smov [#allocation10]   ;;  %s797_s26 = scalar_lea.hbm %s1000_s4, 1024 }
  0x46   :  { %s65_s22 = sshll.u32 %s857_s20, 4  ;;  %p798_p4 = scmp.ne.s32.totalorder %s1000_s4, %s797_s26  ;;  %s66_s22 = int_to_ptr.vmem [resolvable:$true] %s65_s22 }
  0x47   :  { %p801_p5 = scmp.lt.u32.totalorder %s797_s26, %s1000_s4 }
  0x49   :  { %p803_p6 = pnand %p801_p5, %p798_p4 }
  0x4b   :  { %806 = shalt.err (!%p803_p6)
}
  0x4c   :  { %s807_s8 = scalar_lea.vmem %s66_s22, 1024  ;;  %p812_p8 = scmp.lt.s32.totalorder %s66_s22, %s66_s22 }
  0x4d   :  { %p808_p7 = scmp.ne.s32.totalorder %s66_s22, %s807_s8  ;;  %p813_p9 = scmp.lt.s32.totalorder %s807_s8, %s807_s8 }
  0x4f   :  { %p814_p10 = por %p813_p9, %p812_p8 }
  0x51   :  { %p815_p11 = pnand %p814_p10, %p808_p7 }
  0x53   :  { %818 = shalt.err (!%p815_p11)
}
  0x54   :  { %71 = dma.hbm_to_vmem [thread:$0]  %s1000_s4, 1024, %s66_s22, [#allocation9], %s853_s1, %s853_s1, %s854_s17  }
  0x55   :  { %841 = dma.done.wait [#allocation3], 256  }
  0x56   :  { %842 = vsyncadd [#allocation3], 4294967040 }
  0x57   :  { %843 = dma.done.wait [#allocation6], 640  }
  0x58   :  { %844 = vsyncadd [#allocation6], 4294966656 }
  0x59   :  { %845 = dma.done.wait [#allocation9], 3072  }
  0x5a   :  { %846 = vsyncadd [#allocation9], 4294964224  ;;  %v858_v0 = vmov 0   ;;  %v671_v1 = vld [vmem:[#allocation5 + $0x4] ss:$8 sps:$4 sm:$0xff]   ;;  %v88_v5 = vld [vmem:[#allocation2] sm:$0xff] }
  0x5b   :  { %151 = vmatprep.mubr.bf16.mxu0 %v858_v0  ;;  %v673_v2 = vld [vmem:[#allocation5] ss:$8 sps:$4 sm:$0xff]   ;;  %119 = vmatprep.subr.bf16.mxu0 %v671_v1  ;;  %v674_v3 = vld [vmem:[#allocation5 + $0x14] ss:$8 sps:$4 sm:$0xff]   ;;  %v676_v4 = vld [vmem:[#allocation5 + $0x10] ss:$8 sps:$4 sm:$0xff]  }
  0x5c   :  { %120 = vmatpush1.bf16.msra.mxu0 %v673_v2  ;;  %v89_v6 = vld [vmem:[#allocation2 + $0x8] sm:$0xff]  ;;  %vm115_vm0 = vcmask 261120   ;;  %v677_v8 = vld [vmem:[#allocation8 + $0x40] sm:$0xff]   ;;  %v679_v10 = vld [vmem:[#allocation8 + $0x48] sm:$0xff]   ;;  %v859_v25 = vmov 0.0   ;;  %vm861_vm1 = vmmov 0  }
  0x5d   :  { %121 = vmatprep.subr.bf16.mxu0 %v674_v3  ;;  %v90_v7 = vpack.c.bf16 %v89_v6, %v88_v5  ;;  %v678_v9 = vld [vmem:[#allocation8] sm:$0xff]   ;;  %606 = vmatprep.subr.bf16.mxu1 %v677_v8  ;;  %v680_v11 = vld [vmem:[#allocation8 + $0x8] sm:$0xff]   ;;  %v681_v12 = vld [vmem:[#allocation8 + $0x50] sm:$0xff]   ;;  %s862_s4 = smov [#allocation11]  }
  0x5e   :  { %607 = vmatpush3.bf16.msra.mxu1 %v678_v9  ;;  %v682_v13 = vld [vmem:[#allocation8 + $0x10] sm:$0xff]   ;;  %v683_v14 = vld [vmem:[#allocation8 + $0x58] sm:$0xff]   ;;  %v685_v16 = vld [vmem:[#allocation8 + $0x60] sm:$0xff]   ;;  %s561_s1 = sshll.u32 %s862_s4, 4  ;;  %s562_s1 = int_to_ptr.vmem [resolvable:$true] %s561_s1 }
  0x5f   :  { %608 = vmatprep.subr.bf16.mxu1 %v679_v10  ;;  %v684_v15 = vld [vmem:[#allocation8 + $0x18] sm:$0xff]   ;;  %v686_v17 = vld [vmem:[#allocation8 + $0x20] sm:$0xff]   ;;  %v687_v18 = vld [vmem:[#allocation8 + $0x68] sm:$0xff]   ;;  %s819_s17 = scalar_lea.vmem %s562_s1, 256  ;;  %p824_p13 = scmp.lt.s32.totalorder %s562_s1, %s562_s1 }
  0x60   :  { %122 = vmatpush1.bf16.msra.mxu0 %v676_v4  ;;  %v688_v19 = vld [vmem:[#allocation8 + $0x28] sm:$0xff]   ;;  %v689_v20 = vld [vmem:[#allocation8 + $0x70] sm:$0xff]   ;;  %v691_v22 = vld [vmem:[#allocation8 + $0x78] sm:$0xff]   ;;  %p820_p12 = scmp.ne.s32.totalorder %s562_s1, %s819_s17  ;;  %p825_p0 = scmp.lt.s32.totalorder %s819_s17, %s819_s17 }
  0x61   :  { %v690_v21 = vld [vmem:[#allocation8 + $0x30] sm:$0xff]   ;;  %v692_v23 = vld [vmem:[#allocation8 + $0x38] sm:$0xff]   ;;  %v693_v24 = vld [vmem:[#allocation10] sm:$0xff]   ;;  %637 = vmatprep.subr.bf16.mxu0 %v859_v25 }
  0x62   :  { %609 = vmatpush3.bf16.msra.mxu1 %v680_v11  ;;  %v694_v26 = vld [vmem:[#allocation10 + $0x8] sm:$0xff]   ;;  %v695_v27 = vld [vmem:[#allocation10 + $0x10] sm:$0xff]   ;;  %v696_v28 = vld [vmem:[#allocation10 + $0x18] sm:$0xff]   ;;  %p826_p1 = por %p825_p0, %p824_p13 }
  0x63   :  { %579 = vmatmul.mubr.msk.bf16.vlgmr.msra.gmra.mrb[0].mxu0 %vm115_vm0, %v90_v7  ;;  %610 = vmatprep.subr.bf16.mxu1 %v681_v12  ;;  %v697_v29 = vld [vmem:[#allocation10 + $0x20] sm:$0xff]   ;;  %v860_v12 = vmov 1966171168  }
  0x64   :  { %638 = vmatpush3.bf16.msra.mxu0 %v693_v24  ;;  %653 = vmatprep.mubr.msk.bf16.mxu0 %vm861_vm1, %v859_v25  ;;  %p827_p2 = pnand %p826_p1, %p820_p12 }
  0x65   :  { %639 = vmatprep.subr.bf16.mxu0 %v859_v25 }
  0x66   :  { %611 = vmatpush3.bf16.msra.mxu1 %v682_v13  ;;  %v214_v13 = vunpack.c.l.s4 %v860_v12 }
  0x67   :  { %612 = vmatprep.subr.bf16.mxu1 %v683_v14  ;;  %v216_v14 = vlaneseq }
  0x68   :  { %640 = vmatpush3.bf16.msra.mxu0 %v694_v26 }
  0x69   :  { %641 = vmatprep.subr.bf16.mxu0 %v859_v25 }
  0x6a   :  { %613 = vmatpush3.bf16.msra.mxu1 %v684_v15  ;;  %v215_v15 = vunpack.c.0.s8 %v214_v13 }
  0x6b   :  { %614 = vmatprep.subr.bf16.mxu1 %v685_v16  ;;  %v217_v16 = vshrl.u32 %v216_v14, 7 }
  0x6c   :  { %642 = vmatpush3.bf16.msra.mxu0 %v695_v27  ;;  %v205_v27 = vld [vmem:[#allocation7 + $0x1] ss:$4 sm:$0x3] }
  0x6d   :  { %643 = vmatprep.subr.bf16.mxu0 %v859_v25  ;;  %v236_v24 = vsub.s32 1, %v217_v16  ;;  %v232_v26 = vsub.s32 0, %v217_v16 }
  0x6e   :  { %615 = vmatpush3.bf16.msra.mxu1 %v686_v17 }
  0x6f   :  { %616 = vmatprep.subr.bf16.mxu1 %v687_v18  ;;  %v218_v18 = vsub.s32 %v215_v15, %v217_v16 }
  0x70   :  { %644 = vmatpush3.bf16.msra.mxu0 %v696_v28 }
  0x71   :  { %645 = vmatprep.subr.bf16.mxu0 %v859_v25 }
  0x72   :  { %617 = vmatpush3.bf16.msra.mxu1 %v688_v19 }
  0x73   :  { %618 = vmatprep.subr.bf16.mxu1 %v689_v20 }
  0x74   :  { %646 = vmatpush3.bf16.msra.mxu0 %v697_v29 }
  0x75   :  { %647 = vmatprep.subr.bf16.mxu0 %v859_v25 }
  0x76   :  { %619 = vmatpush3.bf16.msra.mxu1 %v690_v21 }
  0x77   :  { %620 = vmatprep.subr.bf16.mxu1 %v691_v22  ;;  %v203_v22 = vld [vmem:[#allocation7] ss:$4 sm:$0x3] }
  0x7a   :  { %621 = vmatpush3.bf16.msra.mxu1 %v692_v23 }
 0x136   :  { %v153_v30 = vpop.f32.mrb[0].mxu0 }
 0x137   :  { %v155_v31 = vpop.f32.mrb[1].mxu0 }
 0x138   :  { %v157_v32 = vpop.f32.mrb[2].mxu0 }
 0x139   :  { %v162_v33 = vadd.f32 %v157_v32, %v153_v30  ;;  %v159_v34 = vpop.f32.mrb[3].mxu0 }
 0x13a   :  { %v169_v35 = vadd.f32 %v159_v34, %v155_v31 }
 0x13b   :  { %v163_v36 = vrot.slane %v162_v33, 4 }
 0x13c   :  { %v170_v37 = vrot.slane %v169_v35, 4 }
 0x13d   :  { %v164_v38 = vadd.f32 %v163_v36, %v162_v33 }
 0x13e   :  { %v171_v39 = vadd.f32 %v170_v37, %v169_v35 }
 0x13f   :  { %v165_v40 = vrot.slane %v164_v38, 2 }
 0x140   :  { %v172_v41 = vrot.slane %v171_v39, 2 }
 0x141   :  { %v166_v42 = vadd.f32 %v165_v40, %v164_v38 }
 0x142   :  { %v173_v43 = vadd.f32 %v172_v41, %v171_v39 }
 0x143   :  { %v167_v44 = vrot.slane %v166_v42, 1 }
 0x144   :  { %v174_v45 = vrot.slane %v173_v43, 1 }
 0x145   :  { %v168_v46 = vadd.f32 %v167_v44, %v166_v42 }
 0x146   :  { %v175_v47 = vadd.f32 %v174_v45, %v173_v43 }
 0x147   :  { %v177_v48 = vmul.f32 0.0625, %v168_v46 }
 0x148   :  { %v178_v49 = vmul.f32 0.0625, %v175_v47  ;;  %v698_v47 = vld [vmem:[#allocation10 + $0x28] sm:$0xff]  }
 0x149   :  { %v179_v50 = vsub.f32 %v153_v30, %v177_v48  ;;  %v181_v51 = vsub.f32 %v157_v32, %v177_v48  ;;  %v248_v30 = vrot.slane %v205_v27, %v232_v26  ;;  %648 = vmatpush3.bf16.msra.mxu0 %v698_v47  ;;  %v699_v48 = vld [vmem:[#allocation10 + $0x30] sm:$0xff]  }
 0x14a   :  { %v180_v52 = vsub.f32 %v155_v31, %v178_v49  ;;  %v182_v53 = vsub.f32 %v159_v34, %v178_v49  ;;  %v252_v31 = vrot.slane %v205_v27, %v236_v24  ;;  %649 = vmatprep.subr.bf16.mxu0 %v859_v25  ;;  %v700_v49 = vld [vmem:[#allocation10 + $0x38] sm:$0xff]  }
 0x14b   :  { %v183_v54 = vmul.f32 %v179_v50, %v179_v50  ;;  %v185_v55 = vmul.f32 %v181_v51, %v181_v51 }
 0x14c   :  { %v184_v56 = vmul.f32 %v180_v52, %v180_v52  ;;  %v186_v57 = vmul.f32 %v182_v53, %v182_v53 }
 0x14d   :  { %v187_v58 = vadd.f32 %v185_v55, %v183_v54  ;;  %650 = vmatpush3.bf16.msra.mxu0 %v699_v48 }
 0x14e   :  { %v194_v59 = vadd.f32 %v186_v57, %v184_v56  ;;  %651 = vmatprep.subr.bf16.mxu0 %v859_v25 }
 0x14f   :  { %v188_v60 = vrot.slane %v187_v58, 4 }
 0x150   :  { %v195_v61 = vrot.slane %v194_v59, 4 }
 0x151   :  { %v189_v62 = vadd.f32 %v188_v60, %v187_v58  ;;  %652 = vmatpush3.bf16.msra.mxu0 %v700_v49 }
 0x152   :  { %v196_v63 = vadd.f32 %v195_v61, %v194_v59 }
 0x153   :  { %v190_v0 = vrot.slane %v189_v62, 2 }
 0x154   :  { %v197_v1 = vrot.slane %v196_v63, 2 }
 0x155   :  { %v191_v2 = vadd.f32 %v190_v0, %v189_v62  ;;  %v597_v62 = vld [vmem:[#allocation7 + $0x3] ss:$0 sm:$0xff] }
 0x156   :  { %v198_v3 = vadd.f32 %v197_v1, %v196_v63 }
 0x157   :  { %v192_v4 = vrot.slane %v191_v2, 1 }
 0x158   :  { %v199_v5 = vrot.slane %v198_v3, 1 }
 0x159   :  { %v193_v6 = vadd.f32 %v192_v4, %v191_v2 }
 0x15a   :  { %v200_v7 = vadd.f32 %v199_v5, %v198_v3 }
 0x15b   :  { %v201_v8 = vmul.f32 0.0625, %v193_v6 }
 0x15c   :  { %v202_v9 = vmul.f32 0.0625, %v200_v7 }
 0x15d   :  { %v206_v10 = vadd.f32 1e-05, %v201_v8 }
 0x15e   :  { %v207_v11 = vadd.f32 1e-05, %v202_v9 }
 0x15f   :  { %701 = vrsqrt.f32 %v206_v10 }
 0x160   :  { %703 = vrsqrt.f32 %v207_v11 }
 0x169   :  { %v702_v17 = vpop.eup %701 }
 0x16a   :  { %v704_v19 = vpop.eup %703 }
 0x16b   :  { %v212_v20 = vcombine.low %v702_v17, %v704_v19 }
 0x16d   :  { %v219_v21 = vrot.slane %v212_v20, %v218_v18 }
 0x16f   :  { %v226_v23 = vrot.slane %v219_v21, %v218_v18 }
 0x171   :  { %v228_v28 = vmul.f32 %v226_v23, %v203_v22 }
 0x173   :  { %v237_v29 = vrot.slane %v228_v28, %v236_v24  ;;  %v233_v32 = vrot.slane %v228_v28, %v232_v26 }
 0x175   :  { %v243_v33 = vmul.f32 %v237_v29, %v182_v53  ;;  %v241_v34 = vmul.f32 %v237_v29, %v180_v52  ;;  %v240_v35 = vmul.f32 %v233_v32, %v179_v50  ;;  %v242_v36 = vmul.f32 %v233_v32, %v181_v51  ;;  %v580_v51 = vld [vmem:[#allocation7 + $0x2] ss:$0 sm:$0xff] }
 0x177   :  { %v256_v37 = vadd.f32 %v252_v31, %v241_v34  ;;  %v258_v38 = vadd.f32 %v252_v31, %v243_v33  ;;  %v255_v39 = vadd.f32 %v248_v30, %v240_v35  ;;  %v257_v40 = vadd.f32 %v248_v30, %v242_v36 }
 0x179   :  { %v260_v41 = vmax.f32 %v256_v37, 0.0  ;;  %v262_v42 = vmax.f32 %v258_v38, 0.0  ;;  %v259_v43 = vmax.f32 %v255_v39, 0.0  ;;  %v261_v44 = vmax.f32 %v257_v40, 0.0 }
 0x17b   :  { %v265_v45 = vpack.c.bf16 %v262_v42, %v260_v41  ;;  %v264_v46 = vpack.c.bf16 %v261_v44, %v259_v43 }
 0x17d   :  { %430 = vmatprep.mubr.bf16.mxu1 %v265_v45 }
 0x17e   :  { %431 = vmatmul.mubr.bf16.vlgmr.msra.gmra.mrb[0].mxu1 %v264_v46 }
 0x251   :  { %v622_v50 = vpop.f32.mrb[0].mxu1 }
 0x252   :  { %v623_v52 = vpop.f32.mrb[1].mxu1 }
 0x253   :  { %v624_v53 = vadd.f32 %v623_v52, %v622_v50  ;;  %v625_v54 = vpop.f32.mrb[2].mxu1 }
 0x254   :  { %v626_v55 = vpop.f32.mrb[3].mxu1 }
 0x255   :  { %v433_v56 = vadd.f32 %v624_v53, %v580_v51  ;;  %v627_v57 = vadd.f32 %v626_v55, %v625_v54 }
 0x257   :  { %v436_v58 = vadd.f32 %v627_v57, %v580_v51  ;;  %v439_v59 = vmax.f32 %v433_v56, 0.0 }
 0x259   :  { %v440_v60 = vmax.f32 %v436_v58, 0.0 }
 0x25b   :  { %v442_v61 = vpack.c.bf16 %v440_v60, %v439_v59 }
 0x25d   :  { %654 = vmatmul.mubr.bf16.vlgmr.msra.gmra.mrb[4].mxu0 %v442_v61 }
 0x330   :  { %v545_v63 = vpop.f32.mrb[4].mxu0 }
 0x331   :  { %v546_v0 = vadd.f32 %v597_v62, %v545_v63  ;;  %v655_v1 = vpop.f32.mrb[5].mxu0 }
 0x332   :  { %v548_v2 = vpop.f32.mrb[6].mxu0 }
 0x333   :  { %705 = vtanh.f32 %v546_v0  ;;  %v549_v25 = vadd.f32 %v597_v62, %v548_v2  ;;  %v656_v3 = vpop.f32.mrb[7].mxu0 }
 0x335   :  { %707 = vtanh.f32 %v549_v25 }
 0x33d   :  { %v706_v4 = vpop.eup %705 }
 0x33e   :  { %554 = vst [vmem:[#allocation11] sm:$0xff] %v706_v4 }
 0x33f   :  { %v708_v5 = vpop.eup %707 }
 0x340   :  { %555 = vst [vmem:[#allocation11 + $0x8] sm:$0xff] %v708_v5 }
 0x341   :  { %830 = shalt.err (!%p827_p2)
}
 0x342   :  { %s831_s9 = scalar_lea.hbm %s1001_s5, 256 }
 0x343   :  { %p832_p3 = scmp.ne.s32.totalorder %s1001_s5, %s831_s9  ;;  %p835_p4 = scmp.lt.u32.totalorder %s831_s9, %s1001_s5 }
 0x345   :  { %p837_p5 = pnand %p835_p4, %p832_p3 }
 0x347   :  { %840 = shalt.err (!%p837_p5)
}
 0x348   :  { %567 = dma.vmem_to_hbm [thread:$0]  %s562_s1, 256, %s1001_s5, [#allocation4], %s851_s30, %s851_s30, %s852_s6  }
 0x349   :  { %847 = dma.done.wait [#allocation4], 256  }
 0x34a   :  { %848 = vsyncadd [#allocation4], 4294967040 }
 0x34b   :  { %571 = vsyncpa [#allocation3], 1 }
 0x34c   :  { %572 = vsyncpa [#allocation6], 1 }
 0x34d   :  { %573 = vsyncpa [#allocation9], 1 }
 0x34e   :  { %574 = vsyncpa [#allocation4], 1 }

</bundles_post_ra>
